<compile_context>
chip_gen: v7x
topology: tpu7x:2x2x1
jax: 0.10.0
libtpu: 0.0.40
codegen_flags: <defaults>
</compile_context>

<pallas_src>
import jax
import jax.numpy as jnp
from jax import lax
from jax.experimental import pallas as pl
from jax.experimental.pallas import tpu as pltpu

LANE = 128
SUBLANE = 8


def _round_up(n: int, m: int) -> int:
    return ((n + m - 1) // m) * m


def qpair_mlp_kernel(xs_ref, w1_ref, w2_ref, w3_ref, b_ref, out_ref):
    """Fused QuestionPairMLP forward.

    xs_ref : [2*Bp, L] int32 -- rows 0:Bp = question-1 ids, rows Bp:2Bp = q2
    w1_ref : [2*Vp, Hp] f32  -- embedding-folded fc1 weight;
                                rows 0:Vp act on q1's bag-of-words,
                                rows Vp:2Vp on q2's.
    w2_ref : [Hp, Hp]  f32   -- fc2 weight (zero padded)
    w3_ref : [Hp, Hp]  f32   -- fc3 weight (zero padded; only [:H2, :2] real)
    b_ref  : [3, Hp]   f32   -- rows = (b1, b2, b3), zero padded
    out_ref: [Bp, Hp]  f32   -- lane-dense output; caller slices [:B, :2]
    """
    n_rows, L = xs_ref.shape            # n_rows = 2 * Bp
    two_vp, _ = w1_ref.shape
    Vp = two_vp // 2
    Bp = out_ref.shape[0]
    inv_L = jnp.float32(1.0 / L)

    # ---- embedding lookup + mean(dim=1) as a bag-of-words matrix -----------
    # bow[r, v] = (# tokens == v in row r) / L ; built with L unrolled VPU
    # compare/select/accumulate passes over a [2Bp, Vp] tile (L is small
    # & static, so the loop unrolls at trace time).
    tokens = xs_ref[...]                                              # [2Bp, L]
    vocab_ids = lax.broadcasted_iota(jnp.int32, (n_rows, Vp), 1)      # [2Bp, Vp]
    bow = jnp.zeros((n_rows, Vp), jnp.float32)
    for l in range(L):
        tok_l = tokens[:, l:l + 1]                                    # [2Bp, 1]
        bow = bow + jnp.where(tok_l == vocab_ids, inv_L, 0.0)

    # ---- fc1 (embedding folded in) + relu -----------------------------------
    # concat(q1, q2) @ W1 == bow1 @ (emb @ W1a) + bow2 @ (emb @ W1b)
    w1 = w1_ref[...]
    h1 = jnp.dot(bow[:Bp, :], w1[:Vp, :], preferred_element_type=jnp.float32)
    h1 = h1 + jnp.dot(bow[Bp:, :], w1[Vp:, :],
                      preferred_element_type=jnp.float32)
    h1 = jnp.maximum(h1 + b_ref[0:1, :], 0.0)                         # [Bp, Hp]

    # ---- fc2 + relu ----------------------------------------------------------
    h2 = jnp.dot(h1, w2_ref[...], preferred_element_type=jnp.float32)
    h2 = jnp.maximum(h2 + b_ref[1:2, :], 0.0)                         # [Bp, Hp]

    # ---- fc3 (lane-dense 128-wide store; only first 2 lanes are real) -------
    out_ref[...] = (jnp.dot(h2, w3_ref[...], preferred_element_type=jnp.float32)
                    + b_ref[2:3, :])


def pack_params(emb, w1, b1, w2, b2, w3, b3):
    """One-time packing of parameters into the kernel layout.

    Weights are expected pre-transposed as [in_features, out_features]
    (transpose of PyTorch's nn.Linear storage), matching y = x @ W + b.
    The frozen embedding table is folded into the fc1 weight here (exact
    linear algebra); this happens once, not per forward call.
    """
    V, E = emb.shape
    H1 = w1.shape[1]
    H2 = w2.shape[1]
    out_dim = w3.shape[1]
    assert w1.shape[0] == 2 * E
    assert max(H1, H2, out_dim) <= LANE, "widths > 128 need wider lane padding"

    Vp = _round_up(V, LANE)
    Hp = LANE  # pad every hidden / output width to one 128-lane tile

    emb_p = jnp.zeros((Vp, E), jnp.float32).at[:V, :].set(
        jnp.asarray(emb, jnp.float32))

    # Fold embedding into fc1:  mean(emb[x]) @ W1a  ==  bow(x) @ (emb @ W1a)
    w1a = emb_p @ jnp.asarray(w1[:E, :], jnp.float32)    # [Vp, H1]
    w1b = emb_p @ jnp.asarray(w1[E:, :], jnp.float32)    # [Vp, H1]
    w1_p = (jnp.zeros((2 * Vp, Hp), jnp.float32)
            .at[:Vp, :H1].set(w1a)
            .at[Vp:, :H1].set(w1b))

    w2_p = jnp.zeros((Hp, Hp), jnp.float32).at[:H1, :H2].set(w2)
    w3_p = jnp.zeros((Hp, Hp), jnp.float32).at[:H2, :out_dim].set(w3)
    b_p = (jnp.zeros((3, Hp), jnp.float32)
           .at[0, :H1].set(b1)
           .at[1, :H2].set(b2)
           .at[2, :out_dim].set(b3))
    return dict(w1=w1_p, w2=w2_p, w3=w3_p, b=b_p, out_dim=out_dim)


def question_pair_mlp(x1, x2, params):
    """Forward pass matching QuestionPairMLP.forward.

    x1, x2: [B, L] int token ids.  params: output of pack_params().
    """
    B, L = x1.shape
    Bp = _round_up(B, SUBLANE)      # sublane-align the batch
    pad = Bp - B
    x1p = jnp.pad(x1.astype(jnp.int32), ((0, pad), (0, 0)))
    x2p = jnp.pad(x2.astype(jnp.int32), ((0, pad), (0, 0)))
    xs = jnp.concatenate([x1p, x2p], axis=0)              # [2Bp, L]

    Hp = params["w3"].shape[1]
    vmem = pl.BlockSpec(memory_space=pltpu.MemorySpace.VMEM)
    out = pl.pallas_call(
        qpair_mlp_kernel,
        out_shape=jax.ShapeDtypeStruct((Bp, Hp), jnp.float32),
        in_specs=[vmem] * 5,
        out_specs=vmem,
        # grid=() single block: all operands (~260 KiB) fit comfortably in
        # VMEM on v5e / v6e / v7x.
    )(xs, params["w1"], params["w2"], params["w3"], params["b"])
    return out[:B, :params["out_dim"]]


if __name__ == "__main__":
    # Small, deterministic config consistent with the module's __init__.
    VOCAB = 50          # vocab_size
    E = 32              # embedding_size
    H1 = 64             # hidden_size_1
    H2 = 32             # hidden_size_2
    B = 8               # batch
    L = 8               # sequence length

    key = jax.random.PRNGKey(0)
    k_emb, k_w1, k_b1, k_w2, k_b2, k_w3, k_b3, k_x1, k_x2 = jax.random.split(key, 9)

    # Frozen embedding matrix (stands in for `embedding_matrix`).
    emb = jax.random.normal(k_emb, (VOCAB, E), dtype=jnp.float32)

    # Linear params, stored as [in, out] (transpose of PyTorch's [out, in]).
    w1 = jax.random.normal(k_w1, (2 * E, H1), dtype=jnp.float32) * 0.1
    b1 = jax.random.normal(k_b1, (H1,), dtype=jnp.float32) * 0.1
    w2 = jax.random.normal(k_w2, (H1, H2), dtype=jnp.float32) * 0.1
    b2 = jax.random.normal(k_b2, (H2,), dtype=jnp.float32) * 0.1
    w3 = jax.random.normal(k_w3, (H2, 2), dtype=jnp.float32) * 0.1
    b3 = jax.random.normal(k_b3, (2,), dtype=jnp.float32) * 0.1

    # Integer question token ids.
    x1 = jax.random.randint(k_x1, (B, L), 0, VOCAB, dtype=jnp.int32)
    x2 = jax.random.randint(k_x2, (B, L), 0, VOCAB, dtype=jnp.int32)

    params = pack_params(emb, w1, b1, w2, b2, w3, b3)
    out = question_pair_mlp(x1, x2, params)
    out = jax.block_until_ready(out)

    # Pure-JAX reference for a correctness sanity check (mirrors the PyTorch
    # module exactly: gather -> mean -> concat -> fc1/relu -> fc2/relu -> fc3).
    q1 = jnp.take(emb, x1, axis=0).mean(axis=1)
    q2 = jnp.take(emb, x2, axis=0).mean(axis=1)
    x = jnp.concatenate([q1, q2], axis=1)
    h1 = jnp.maximum(x @ w1 + b1, 0.0)
    h2 = jnp.maximum(h1 @ w2 + b2, 0.0)
    ref = h2 @ w3 + b3

    assert out.shape == (B, 2)
    assert jnp.allclose(out, ref, atol=1e-4, rtol=1e-4)
    print("KERNEL_OK")
</pallas_src>

<mosaic_0001>
module attributes {stable_mosaic.version = 11 : i64} {
  func.func @qpair_mlp_kernel(%arg0: memref<16x8xi32, #tpu.memory_space<vmem>>, %arg1: memref<256x128xf32, #tpu.memory_space<vmem>>, %arg2: memref<128x128xf32, #tpu.memory_space<vmem>>, %arg3: memref<128x128xf32, #tpu.memory_space<vmem>>, %arg4: memref<3x128xf32, #tpu.memory_space<vmem>>, %arg5: memref<8x128xf32, #tpu.memory_space<vmem>>) attributes {dimension_semantics = [], scalar_prefetch = 0 : i64, scratch_operands = 0 : i64, tpu.core_type = #tpu.core_type<tc>} {
    %c0 = arith.constant 0 : index
    %c0_0 = arith.constant 0 : index
    %0 = vector.load %arg0[%c0, %c0_0] : memref<16x8xi32, #tpu.memory_space<vmem>>, vector<16x8xi32>
    %1 = tpu.iota {dimensions = array<i32: 1>} : vector<16x128xi32>
    %cst = arith.constant 0.000000e+00 : f32
    %2 = vector.broadcast %cst : f32 to vector<16x128xf32>
    %3 = vector.extract_strided_slice %0 {offsets = [0, 0], sizes = [16, 1], strides = [1, 1]} : vector<16x8xi32> to vector<16x1xi32>
    %4 = vector.broadcast %3 : vector<16x1xi32> to vector<16x128xi32>
    %5 = arith.cmpi eq, %4, %1 : vector<16x128xi32>
    %cst_1 = arith.constant 1.250000e-01 : f32
    %cst_2 = arith.constant 0.000000e+00 : f32
    %6 = vector.broadcast %cst_1 : f32 to vector<16x128xf32>
    %7 = vector.broadcast %cst_2 : f32 to vector<16x128xf32>
    %8 = arith.select %5, %6, %7 : vector<16x128xi1>, vector<16x128xf32>
    %9 = arith.addf %2, %8 : vector<16x128xf32>
    %10 = vector.extract_strided_slice %0 {offsets = [0, 1], sizes = [16, 1], strides = [1, 1]} : vector<16x8xi32> to vector<16x1xi32>
    %11 = vector.broadcast %10 : vector<16x1xi32> to vector<16x128xi32>
    %12 = arith.cmpi eq, %11, %1 : vector<16x128xi32>
    %cst_3 = arith.constant 1.250000e-01 : f32
    %cst_4 = arith.constant 0.000000e+00 : f32
    %13 = vector.broadcast %cst_3 : f32 to vector<16x128xf32>
    %14 = vector.broadcast %cst_4 : f32 to vector<16x128xf32>
    %15 = arith.select %12, %13, %14 : vector<16x128xi1>, vector<16x128xf32>
    %16 = arith.addf %9, %15 : vector<16x128xf32>
    %17 = vector.extract_strided_slice %0 {offsets = [0, 2], sizes = [16, 1], strides = [1, 1]} : vector<16x8xi32> to vector<16x1xi32>
    %18 = vector.broadcast %17 : vector<16x1xi32> to vector<16x128xi32>
    %19 = arith.cmpi eq, %18, %1 : vector<16x128xi32>
    %cst_5 = arith.constant 1.250000e-01 : f32
    %cst_6 = arith.constant 0.000000e+00 : f32
    %20 = vector.broadcast %cst_5 : f32 to vector<16x128xf32>
    %21 = vector.broadcast %cst_6 : f32 to vector<16x128xf32>
    %22 = arith.select %19, %20, %21 : vector<16x128xi1>, vector<16x128xf32>
    %23 = arith.addf %16, %22 : vector<16x128xf32>
    %24 = vector.extract_strided_slice %0 {offsets = [0, 3], sizes = [16, 1], strides = [1, 1]} : vector<16x8xi32> to vector<16x1xi32>
    %25 = vector.broadcast %24 : vector<16x1xi32> to vector<16x128xi32>
    %26 = arith.cmpi eq, %25, %1 : vector<16x128xi32>
    %cst_7 = arith.constant 1.250000e-01 : f32
    %cst_8 = arith.constant 0.000000e+00 : f32
    %27 = vector.broadcast %cst_7 : f32 to vector<16x128xf32>
    %28 = vector.broadcast %cst_8 : f32 to vector<16x128xf32>
    %29 = arith.select %26, %27, %28 : vector<16x128xi1>, vector<16x128xf32>
    %30 = arith.addf %23, %29 : vector<16x128xf32>
    %31 = vector.extract_strided_slice %0 {offsets = [0, 4], sizes = [16, 1], strides = [1, 1]} : vector<16x8xi32> to vector<16x1xi32>
    %32 = vector.broadcast %31 : vector<16x1xi32> to vector<16x128xi32>
    %33 = arith.cmpi eq, %32, %1 : vector<16x128xi32>
    %cst_9 = arith.constant 1.250000e-01 : f32
    %cst_10 = arith.constant 0.000000e+00 : f32
    %34 = vector.broadcast %cst_9 : f32 to vector<16x128xf32>
    %35 = vector.broadcast %cst_10 : f32 to vector<16x128xf32>
    %36 = arith.select %33, %34, %35 : vector<16x128xi1>, vector<16x128xf32>
    %37 = arith.addf %30, %36 : vector<16x128xf32>
    %38 = vector.extract_strided_slice %0 {offsets = [0, 5], sizes = [16, 1], strides = [1, 1]} : vector<16x8xi32> to vector<16x1xi32>
    %39 = vector.broadcast %38 : vector<16x1xi32> to vector<16x128xi32>
    %40 = arith.cmpi eq, %39, %1 : vector<16x128xi32>
    %cst_11 = arith.constant 1.250000e-01 : f32
    %cst_12 = arith.constant 0.000000e+00 : f32
    %41 = vector.broadcast %cst_11 : f32 to vector<16x128xf32>
    %42 = vector.broadcast %cst_12 : f32 to vector<16x128xf32>
    %43 = arith.select %40, %41, %42 : vector<16x128xi1>, vector<16x128xf32>
    %44 = arith.addf %37, %43 : vector<16x128xf32>
    %45 = vector.extract_strided_slice %0 {offsets = [0, 6], sizes = [16, 1], strides = [1, 1]} : vector<16x8xi32> to vector<16x1xi32>
    %46 = vector.broadcast %45 : vector<16x1xi32> to vector<16x128xi32>
    %47 = arith.cmpi eq, %46, %1 : vector<16x128xi32>
    %cst_13 = arith.constant 1.250000e-01 : f32
    %cst_14 = arith.constant 0.000000e+00 : f32
    %48 = vector.broadcast %cst_13 : f32 to vector<16x128xf32>
    %49 = vector.broadcast %cst_14 : f32 to vector<16x128xf32>
    %50 = arith.select %47, %48, %49 : vector<16x128xi1>, vector<16x128xf32>
    %51 = arith.addf %44, %50 : vector<16x128xf32>
    %52 = vector.extract_strided_slice %0 {offsets = [0, 7], sizes = [16, 1], strides = [1, 1]} : vector<16x8xi32> to vector<16x1xi32>
    %53 = vector.broadcast %52 : vector<16x1xi32> to vector<16x128xi32>
    %54 = arith.cmpi eq, %53, %1 : vector<16x128xi32>
    %cst_15 = arith.constant 1.250000e-01 : f32
    %cst_16 = arith.constant 0.000000e+00 : f32
    %55 = vector.broadcast %cst_15 : f32 to vector<16x128xf32>
    %56 = vector.broadcast %cst_16 : f32 to vector<16x128xf32>
    %57 = arith.select %54, %55, %56 : vector<16x128xi1>, vector<16x128xf32>
    %58 = arith.addf %51, %57 : vector<16x128xf32>
    %c0_17 = arith.constant 0 : index
    %c0_18 = arith.constant 0 : index
    %59 = vector.load %arg1[%c0_17, %c0_18] : memref<256x128xf32, #tpu.memory_space<vmem>>, vector<256x128xf32>
    %60 = vector.extract_strided_slice %58 {offsets = [0, 0], sizes = [8, 128], strides = [1, 1]} : vector<16x128xf32> to vector<8x128xf32>
    %61 = vector.extract_strided_slice %59 {offsets = [0, 0], sizes = [128, 128], strides = [1, 1]} : vector<256x128xf32> to vector<128x128xf32>
    %cst_19 = arith.constant dense<0.000000e+00> : vector<8x128xf32>
    %62 = tpu.matmul %60, %61, %cst_19 {dimension_numbers = #tpu.dot_dimension_numbers<[1], [0], [0], [1], [0, 0, 1, 1], [], []>} : vector<8x128xf32>, vector<128x128xf32>, vector<8x128xf32> -> vector<8x128xf32>
    %63 = vector.extract_strided_slice %58 {offsets = [8, 0], sizes = [8, 128], strides = [1, 1]} : vector<16x128xf32> to vector<8x128xf32>
    %64 = vector.extract_strided_slice %59 {offsets = [128, 0], sizes = [128, 128], strides = [1, 1]} : vector<256x128xf32> to vector<128x128xf32>
    %cst_20 = arith.constant dense<0.000000e+00> : vector<8x128xf32>
    %65 = tpu.matmul %63, %64, %cst_20 {dimension_numbers = #tpu.dot_dimension_numbers<[1], [0], [0], [1], [0, 0, 1, 1], [], []>} : vector<8x128xf32>, vector<128x128xf32>, vector<8x128xf32> -> vector<8x128xf32>
    %66 = arith.addf %62, %65 : vector<8x128xf32>
    %c0_21 = arith.constant 0 : index
    %c0_22 = arith.constant 0 : index
    %67 = vector.load %arg4[%c0_21, %c0_22] : memref<3x128xf32, #tpu.memory_space<vmem>>, vector<1x128xf32>
    %68 = vector.broadcast %67 : vector<1x128xf32> to vector<8x128xf32>
    %69 = arith.addf %66, %68 : vector<8x128xf32>
    %cst_23 = arith.constant 0.000000e+00 : f32
    %70 = vector.broadcast %cst_23 : f32 to vector<8x128xf32>
    %71 = arith.maximumf %69, %70 : vector<8x128xf32>
    %c0_24 = arith.constant 0 : index
    %c0_25 = arith.constant 0 : index
    %72 = vector.load %arg2[%c0_24, %c0_25] : memref<128x128xf32, #tpu.memory_space<vmem>>, vector<128x128xf32>
    %cst_26 = arith.constant dense<0.000000e+00> : vector<8x128xf32>
    %73 = tpu.matmul %71, %72, %cst_26 {dimension_numbers = #tpu.dot_dimension_numbers<[1], [0], [0], [1], [0, 0, 1, 1], [], []>} : vector<8x128xf32>, vector<128x128xf32>, vector<8x128xf32> -> vector<8x128xf32>
    %c1 = arith.constant 1 : index
    %c0_27 = arith.constant 0 : index
    %74 = vector.load %arg4[%c1, %c0_27] : memref<3x128xf32, #tpu.memory_space<vmem>>, vector<1x128xf32>
    %75 = vector.broadcast %74 : vector<1x128xf32> to vector<8x128xf32>
    %76 = arith.addf %73, %75 : vector<8x128xf32>
    %cst_28 = arith.constant 0.000000e+00 : f32
    %77 = vector.broadcast %cst_28 : f32 to vector<8x128xf32>
    %78 = arith.maximumf %76, %77 : vector<8x128xf32>
    %c0_29 = arith.constant 0 : index
    %c0_30 = arith.constant 0 : index
    %79 = vector.load %arg3[%c0_29, %c0_30] : memref<128x128xf32, #tpu.memory_space<vmem>>, vector<128x128xf32>
    %cst_31 = arith.constant dense<0.000000e+00> : vector<8x128xf32>
    %80 = tpu.matmul %78, %79, %cst_31 {dimension_numbers = #tpu.dot_dimension_numbers<[1], [0], [0], [1], [0, 0, 1, 1], [], []>} : vector<8x128xf32>, vector<128x128xf32>, vector<8x128xf32> -> vector<8x128xf32>
    %c2 = arith.constant 2 : index
    %c0_32 = arith.constant 0 : index
    %81 = vector.load %arg4[%c2, %c0_32] : memref<3x128xf32, #tpu.memory_space<vmem>>, vector<1x128xf32>
    %82 = vector.broadcast %81 : vector<1x128xf32> to vector<8x128xf32>
    %83 = arith.addf %80, %82 : vector<8x128xf32>
    %c0_33 = arith.constant 0 : index
    %c0_34 = arith.constant 0 : index
    %84 = vector.load %arg5[%c0_33, %c0_34] : memref<8x128xf32, #tpu.memory_space<vmem>>, vector<8x128xf32>
    tpu.vector_store %arg5[%c0_33, %c0_34], %83 {strides = array<i32>} : memref<8x128xf32, #tpu.memory_space<vmem>>, vector<8x128xf32>,
    return
  }
}

</mosaic_0001>

<bundles_post_ra>
// kernel: tpu_custom_call.1
= control target key start
LH: loop header
LB: loop body
LE: loop exit
PB: predicated region body
PF: predicated region fallthrough
CT: control target
= control target key end

     0   :  { %10 = vsyncpa [#allocation3], 0  ;;  %s1174_s0 = inlined_call_operand.vmem [shape: s32[16,8], index: 0, kind: input, shape index: {}]   ;;  %s1175_s1 = inlined_call_operand.hbm [shape: f32[256,128], index: 1, kind: input, shape index: {}]   ;;  %s1176_s2 = inlined_call_operand.hbm [shape: f32[128,128], index: 2, kind: input, shape index: {}]   ;;  %s1177_s3 = inlined_call_operand.hbm [shape: f32[128,128], index: 3, kind: input, shape index: {}]   ;;  %s1178_s4 = inlined_call_operand.vmem [shape: f32[3,128], index: 4, kind: input, shape index: {}]   ;;  %s1179_s5 = inlined_call_operand.hbm [shape: f32[8,128], index: 5, kind: output, shape index: {}]  }
   0x1   :  { %11 = vsyncpa [#allocation6], 0 }
   0x2   :  { %12 = vsyncpa [#allocation4], 0  ;;  %s972_s18 = smov [#allocation5]   ;;  %s973_s20 = smov [#allocation2]  }
   0x3   :  { %s32_s19 = sshll.u32 %s972_s18, 4  ;;  %s20_s21 = sshll.u32 %s973_s20, 4  ;;  %s33_s19 = int_to_ptr.vmem [resolvable:$true] %s32_s19  ;;  %s1019_s21 = int_to_ptr.vmem [resolvable:$true] %s20_s21 }
   0x4   :  { %s878_s24 = scalar_lea.hbm %s1176_s2, 2048 }
   0x5   :  { %p879_p0 = scmp.ne.s32.totalorder %s1176_s2, %s878_s24  ;;  %p882_p1 = scmp.lt.u32.totalorder %s878_s24, %s1176_s2 }
   0x7   :  { %p884_p2 = pnand %p882_p1, %p879_p0 }
   0x9   :  { %887 = shalt.err (!%p884_p2)
}
   0xa   :  { %s888_s29 = scalar_lea.vmem %s33_s19, 2048  ;;  %p893_p4 = scmp.lt.s32.totalorder %s33_s19, %s33_s19 }
   0xb   :  { %p889_p3 = scmp.ne.s32.totalorder %s33_s19, %s888_s29  ;;  %p894_p5 = scmp.lt.s32.totalorder %s888_s29, %s888_s29 }
   0xd   :  { %p895_p6 = por %p894_p5, %p893_p4 }
   0xf   :  { %p896_p7 = pnand %p895_p6, %p889_p3 }
  0x11   :  { %899 = shalt.err (!%p896_p7)
}
  0x12   :  { %s974_s30 = smov 128   ;;  %s975_s6 = smov 8  }
  0x13   :  { %38 = dma.hbm_to_vmem [thread:$0]  %s1176_s2, 2048, %s33_s19, [#allocation6], %s974_s30, %s974_s30, %s975_s6  }
  0x14   :  { %s900_s11 = scalar_lea.hbm %s1175_s1, 4096 }
  0x15   :  { %p901_p8 = scmp.ne.s32.totalorder %s1175_s1, %s900_s11  ;;  %p904_p9 = scmp.lt.u32.totalorder %s900_s11, %s1175_s1 }
  0x17   :  { %p906_p10 = pnand %p904_p9, %p901_p8 }
  0x19   :  { %909 = shalt.err (!%p906_p10)
}
  0x1a   :  { %s910_s16 = scalar_lea.vmem %s1019_s21, 4096  ;;  %p915_p12 = scmp.lt.s32.totalorder %s1019_s21, %s1019_s21 }
  0x1b   :  { %p911_p11 = scmp.ne.s32.totalorder %s1019_s21, %s910_s16  ;;  %p916_p13 = scmp.lt.s32.totalorder %s910_s16, %s910_s16 }
  0x1d   :  { %p917_p0 = por %p916_p13, %p915_p12 }
  0x1f   :  { %p918_p1 = pnand %p917_p0, %p911_p11 }
  0x21   :  { %921 = shalt.err (!%p918_p1)
}
  0x22   :  { %26 = dma.hbm_to_vmem [thread:$0]  %s1175_s1, 4096, %s1019_s21, [#allocation3], %s974_s30, %s974_s30, %s975_s6  }
  0x23   :  { %s976_s18 = smov [#allocation7]   ;;  %s922_s23 = scalar_lea.hbm %s1177_s3, 2048 }
  0x24   :  { %s44_s19 = sshll.u32 %s976_s18, 4  ;;  %p923_p2 = scmp.ne.s32.totalorder %s1177_s3, %s922_s23  ;;  %s45_s19 = int_to_ptr.vmem [resolvable:$true] %s44_s19 }
  0x25   :  { %p926_p3 = scmp.lt.u32.totalorder %s922_s23, %s1177_s3 }
  0x27   :  { %p928_p4 = pnand %p926_p3, %p923_p2 }
  0x29   :  { %931 = shalt.err (!%p928_p4)
}
  0x2a   :  { %s932_s28 = scalar_lea.vmem %s45_s19, 2048  ;;  %p937_p6 = scmp.lt.s32.totalorder %s45_s19, %s45_s19 }
  0x2b   :  { %p933_p5 = scmp.ne.s32.totalorder %s45_s19, %s932_s28  ;;  %p938_p7 = scmp.lt.s32.totalorder %s932_s28, %s932_s28 }
  0x2d   :  { %p939_p8 = por %p938_p7, %p937_p6 }
  0x2f   :  { %p940_p9 = pnand %p939_p8, %p933_p5 }
  0x31   :  { %943 = shalt.err (!%p940_p9)
}
  0x32   :  { %50 = dma.hbm_to_vmem [thread:$0]  %s1177_s3, 2048, %s45_s19, [#allocation6], %s974_s30, %s974_s30, %s975_s6  }
  0x33   :  { %966 = dma.done.wait [#allocation3], 4096  }
  0x34   :  { %967 = vsyncadd [#allocation3], 4294963200 }
  0x35   :  { %968 = dma.done.wait [#allocation6], 4096  }
  0x36   :  { %969 = vsyncadd [#allocation6], 4294963200  ;;  %v977_v0 = vmov 1   ;;  %v978_v1 = vmov 0   ;;  %v1074_v2 = vld [vmem:[%s1174_s0] sm:$0xff]  ;;  %v1081_v3 = vld [vmem:[%s1174_s0 + $0x8] sm:$0xff] }
  0x37   :  { %866 = vset.pattern.permute.xlu1 %v977_v0  ;;  %865 = vset.pattern.permute.xlu0 %v978_v1  ;;  %v979_v4 = vmov 2   ;;  %v162_v5 = vld [vmem:[#allocation2] sm:$0xff]  ;;  %v163_v6 = vld [vmem:[#allocation2 + $0x8] sm:$0xff]  ;;  %v980_v8 = vmov 0.0|0.0   ;;  %v164_v11 = vld [vmem:[#allocation2 + $0x10] sm:$0xff]  ;;  %v981_v12 = vmov 3   ;;  %v64_v1 = vlaneseq }
  0x38   :  { %79 = vperm.xlu1 %866, %v1074_v2   ;;  %67 = vperm.xlu0 %865, %v1074_v2   ;;  %v777_v7 = vpack.c.bf16 %v163_v6, %v162_v5  ;;  %v178_v9 = vld [vmem:[#allocation2 + $0x80] sm:$0xff]  ;;  %v179_v10 = vld [vmem:[#allocation2 + $0x88] sm:$0xff]  ;;  %v165_v14 = vld [vmem:[#allocation2 + $0x18] sm:$0xff]  ;;  %v982_v21 = vmov 4   ;;  %v983_v22 = vmov 5   ;;  %v984_v30 = vmov 6  }
  0x39   :  { %776 = vmatprep.subr.bf16.mxu1 %v980_v8  ;;  %752 = vmatprep.subr.bf16.mxu0 %v980_v8  ;;  %v753_v13 = vpack.c.bf16 %v179_v10, %v178_v9  ;;  %v780_v15 = vpack.c.bf16 %v165_v14, %v164_v11  ;;  %v180_v16 = vld [vmem:[#allocation2 + $0x90] sm:$0xff]  ;;  %v181_v17 = vld [vmem:[#allocation2 + $0x98] sm:$0xff]  ;;  %v166_v18 = vld [vmem:[#allocation2 + $0x20] sm:$0xff]  ;;  %v985_v43 = vmov 7   ;;  %vm986_vm0 = vmmov 0   ;;  %s988_s12 = smov [#allocation8]  }
  0x3a   :  { %778 = vmatpush3.bf16.msra.mxu1 %v777_v7  ;;  %v756_v19 = vpack.c.bf16 %v181_v17, %v180_v16  ;;  %v167_v20 = vld [vmem:[#allocation2 + $0x28] sm:$0xff]  ;;  %v182_v24 = vld [vmem:[#allocation2 + $0xa0] sm:$0xff]  ;;  %v168_v26 = vld [vmem:[#allocation2 + $0x30] sm:$0xff]  ;;  %v987_v58 = vmov 0.0   ;;  %s531_s13 = sshll.u32 %s988_s12, 4  ;;  %s532_s13 = int_to_ptr.vmem [resolvable:$true] %s531_s13 }
  0x3b   :  { %779 = vmatprep.subr.bf16.mxu1 %v980_v8  ;;  %754 = vmatpush3.bf16.msra.mxu0 %v753_v13  ;;  %v783_v23 = vpack.c.bf16 %v167_v20, %v166_v18  ;;  %v183_v25 = vld [vmem:[#allocation2 + $0xa8] sm:$0xff]  ;;  %v169_v28 = vld [vmem:[#allocation2 + $0x38] sm:$0xff]  ;;  %v184_v31 = vld [vmem:[#allocation2 + $0xb0] sm:$0xff]  ;;  %s944_s14 = scalar_lea.vmem %s532_s13, 128  ;;  %p949_p11 = scmp.lt.s32.totalorder %s532_s13, %s532_s13 }
  0x3c   :  { %82 = vperm.xlu1 %866, %v1081_v3   ;;  %70 = vperm.xlu0 %865, %v1081_v3   ;;  %v759_v27 = vpack.c.bf16 %v183_v25, %v182_v24  ;;  %v786_v29 = vpack.c.bf16 %v169_v28, %v168_v26  ;;  %v185_v32 = vld [vmem:[#allocation2 + $0xb8] sm:$0xff]  ;;  %v170_v33 = vld [vmem:[#allocation2 + $0x40] sm:$0xff]  ;;  %v171_v35 = vld [vmem:[#allocation2 + $0x48] sm:$0xff]  ;;  %p945_p10 = scmp.ne.s32.totalorder %s532_s13, %s944_s14  ;;  %p950_p12 = scmp.lt.s32.totalorder %s944_s14, %s944_s14 }
  0x3d   :  { %755 = vmatprep.subr.bf16.mxu0 %v980_v8  ;;  %v762_v34 = vpack.c.bf16 %v185_v32, %v184_v31  ;;  %v789_v36 = vpack.c.bf16 %v171_v35, %v170_v33  ;;  %v186_v37 = vld [vmem:[#allocation2 + $0xc0] sm:$0xff]  ;;  %v187_v38 = vld [vmem:[#allocation2 + $0xc8] sm:$0xff]  ;;  %v172_v39 = vld [vmem:[#allocation2 + $0x50] sm:$0xff]  ;;  %679 = vmatprep.mubr.msk.f32.mxu1 %vm986_vm0, %v987_v58 }
  0x3e   :  { %781 = vmatpush3.bf16.msra.mxu1 %v780_v15  ;;  %v765_v40 = vpack.c.bf16 %v187_v38, %v186_v37  ;;  %v173_v41 = vld [vmem:[#allocation2 + $0x58] sm:$0xff]  ;;  %v188_v44 = vld [vmem:[#allocation2 + $0xd0] sm:$0xff]  ;;  %v174_v46 = vld [vmem:[#allocation2 + $0x60] sm:$0xff]  ;;  %644 = vmatprep.mubr.msk.f32.mxu0 %vm986_vm0, %v987_v58  ;;  %p951_p13 = por %p950_p12, %p949_p11 }
  0x3f   :  { %782 = vmatprep.subr.bf16.mxu1 %v980_v8  ;;  %757 = vmatpush3.bf16.msra.mxu0 %v756_v19  ;;  %v792_v42 = vpack.c.bf16 %v173_v41, %v172_v39  ;;  %v189_v45 = vld [vmem:[#allocation2 + $0xd8] sm:$0xff]  ;;  %v175_v48 = vld [vmem:[#allocation2 + $0x68] sm:$0xff]  ;;  %v190_v50 = vld [vmem:[#allocation2 + $0xe0] sm:$0xff] }
  0x40   :  { %868 = vset.pattern.permute.xlu1 %v979_v4  ;;  %867 = vset.pattern.permute.xlu0 %v979_v4  ;;  %v768_v47 = vpack.c.bf16 %v189_v45, %v188_v44  ;;  %v795_v49 = vpack.c.bf16 %v175_v48, %v174_v46  ;;  %v191_v51 = vld [vmem:[#allocation2 + $0xe8] sm:$0xff]  ;;  %v176_v52 = vld [vmem:[#allocation2 + $0x70] sm:$0xff]  ;;  %v177_v54 = vld [vmem:[#allocation2 + $0x78] sm:$0xff]  ;;  %v65_v4 = vand.u32 127, %v64_v1  ;;  %p952_p0 = pnand %p951_p13, %p945_p10 }
  0x41   :  { %94 = vperm.xlu1 %868, %v1081_v3   ;;  %91 = vperm.xlu0 %867, %v1074_v2   ;;  %v771_v53 = vpack.c.bf16 %v191_v51, %v190_v50  ;;  %v798_v55 = vpack.c.bf16 %v177_v54, %v176_v52  ;;  %v192_v56 = vld [vmem:[#allocation2 + $0xf0] sm:$0xff]  ;;  %v193_v57 = vld [vmem:[#allocation2 + $0xf8] sm:$0xff]  ;;  %v341_v41 = vld [vmem:[#allocation5] sm:$0xff] }
  0x42   :  { %784 = vmatpush3.bf16.msra.mxu1 %v783_v23  ;;  %758 = vmatprep.subr.bf16.mxu0 %v980_v8  ;;  %v774_v59 = vpack.c.bf16 %v193_v57, %v192_v56  ;;  %v343_v48 = vld [vmem:[#allocation5 + $0x10] sm:$0xff]  ;;  %v345_v51 = vld [vmem:[#allocation5 + $0x20] sm:$0xff]  ;;  %v346_v52 = vld [vmem:[#allocation5 + $0x28] sm:$0xff] }
  0x43   :  { %785 = vmatprep.subr.bf16.mxu1 %v980_v8  ;;  %760 = vmatpush3.bf16.msra.mxu0 %v759_v27  ;;  %v347_v54 = vld [vmem:[#allocation5 + $0x30] sm:$0xff]  ;;  %v349_v57 = vld [vmem:[#allocation5 + $0x40] sm:$0xff] }
  0x44   :  { %761 = vmatprep.subr.bf16.mxu0 %v980_v8 }
  0x45   :  { %869 = vset.pattern.permute.xlu1 %v981_v12  ;;  %870 = vset.pattern.permute.xlu0 %v981_v12 }
  0x46   :  { %103 = vperm.xlu1 %869, %v1074_v2   ;;  %106 = vperm.xlu0 %870, %v1081_v3  }
  0x47   :  { %787 = vmatpush3.bf16.msra.mxu1 %v786_v29  ;;  %763 = vmatpush3.bf16.msra.mxu0 %v762_v34 }
  0x48   :  { %788 = vmatprep.subr.bf16.mxu1 %v980_v8  ;;  %764 = vmatprep.subr.bf16.mxu0 %v980_v8 }
  0x4a   :  { %871 = vset.pattern.permute.xlu1 %v982_v21  ;;  %872 = vset.pattern.permute.xlu0 %v983_v22 }
  0x4b   :  { %115 = vperm.xlu1 %871, %v1074_v2   ;;  %127 = vperm.xlu0 %872, %v1074_v2  }
  0x4c   :  { %790 = vmatpush3.bf16.msra.mxu1 %v789_v36  ;;  %766 = vmatpush3.bf16.msra.mxu0 %v765_v40 }
  0x4d   :  { %791 = vmatprep.subr.bf16.mxu1 %v980_v8  ;;  %767 = vmatprep.subr.bf16.mxu0 %v980_v8 }
  0x4f   :  { %118 = vperm.xlu1 %871, %v1081_v3   ;;  %875 = vset.pattern.permute.xlu0 %v984_v30 }
  0x50   :  { %142 = vperm.xlu0 %875, %v1081_v3   ;;  %793 = vmatpush3.bf16.msra.mxu1 %v792_v42  ;;  %v342_v42 = vld [vmem:[#allocation5 + $0x8] sm:$0xff] }
  0x51   :  { %794 = vmatprep.subr.bf16.mxu1 %v980_v8  ;;  %769 = vmatpush3.bf16.msra.mxu0 %v768_v47  ;;  %v801_v46 = vpack.c.bf16 %v342_v42, %v341_v41  ;;  %v543_v42 = vld [vmem:[%s1178_s4 + $0x2] ss:$0 sm:$0xff] }
  0x52   :  { %770 = vmatprep.subr.bf16.mxu0 %v980_v8 }
  0x53   :  { %873 = vset.pattern.permute.xlu1 %v983_v22 }
  0x54   :  { %130 = vperm.xlu1 %873, %v1081_v3   ;;  %877 = vset.pattern.permute.xlu0 %v985_v43 }
  0x55   :  { %796 = vmatpush3.bf16.msra.mxu1 %v795_v49  ;;  %772 = vmatpush3.bf16.msra.mxu0 %v771_v53  ;;  %v344_v49 = vld [vmem:[#allocation5 + $0x18] sm:$0xff]  ;;  %v807_v53 = vpack.c.bf16 %v346_v52, %v345_v51 }
  0x56   :  { %797 = vmatprep.subr.bf16.mxu1 %v980_v8  ;;  %773 = vmatprep.subr.bf16.mxu0 %v980_v8  ;;  %v804_v50 = vpack.c.bf16 %v344_v49, %v343_v48 }
  0x58   :  { %874 = vset.pattern.permute.xlu1 %v984_v30 }
  0x59   :  { %139 = vperm.xlu1 %874, %v1074_v2   ;;  %799 = vmatpush3.bf16.msra.mxu1 %v798_v55  ;;  %v348_v55 = vld [vmem:[#allocation5 + $0x38] sm:$0xff] }
  0x5a   :  { %824 = vmatprep.subr.bf16.mxu1 %v980_v8  ;;  %775 = vmatpush3.bf16.msra.mxu0 %v774_v59  ;;  %v810_v56 = vpack.c.bf16 %v348_v55, %v347_v54  ;;  %v350_v59 = vld [vmem:[#allocation5 + $0x48] sm:$0xff] }
  0x5b   :  { %800 = vmatprep.subr.bf16.mxu0 %v980_v8 }
  0x5d   :  { %876 = vset.pattern.permute.xlu1 %v985_v43 }
  0x5e   :  { %151 = vperm.xlu1 %876, %v1074_v2  }
  0x62   :  { %154 = vperm.xlu1 %876, %v1081_v3  }
  0xb7   :  { %v80_v60 = vpop.permute.xlu1 %79  ;;  %v68_v62 = vpop.permute.xlu0 %67 }
  0xb8   :  { %vm84_vm1 = vcmp.eq.s32.totalorder %v80_v60, %v65_v4  ;;  %vm72_vm2 = vcmp.eq.s32.totalorder %v68_v62, %v65_v4  ;;  %v813_v60 = vpack.c.bf16 %v350_v59, %v349_v57 }
  0xb9   :  { %v86_v7 = vsel %vm84_vm1, 0.125, %v987_v58  ;;  %v74_v9 = vsel %vm72_vm2, 0.125, %v987_v58 }
  0xba   :  { %v88_v12 = vadd.f32 %v86_v7, %v74_v9  ;;  %v435_v7 = vld [vmem:[#allocation7 + $0x10] sm:$0xff] }
  0xbb   :  { %v83_v61 = vpop.permute.xlu1 %82  ;;  %v71_v0 = vpop.permute.xlu0 %70 }
  0xbc   :  { %vm85_vm4 = vcmp.eq.s32.totalorder %v83_v61, %v65_v4  ;;  %vm73_vm5 = vcmp.eq.s32.totalorder %v71_v0, %v65_v4  ;;  %v352_v61 = vld [vmem:[#allocation5 + $0x58] sm:$0xff]  ;;  %v354_v0 = vld [vmem:[#allocation5 + $0x68] sm:$0xff] }
  0xbd   :  { %v87_v13 = vsel %vm85_vm4, 0.125, %v987_v58  ;;  %v75_v14 = vsel %vm73_vm5, 0.125, %v987_v58 }
  0xbe   :  { %v89_v21 = vadd.f32 %v87_v13, %v75_v14  ;;  %v438_v13 = vld [vmem:[#allocation7 + $0x28] sm:$0xff] }
  0xc0   :  { %v95_v63 = vpop.permute.xlu1 %94  ;;  %v92_v5 = vpop.permute.xlu0 %91 }
  0xc1   :  { %vm96_vm3 = vcmp.eq.s32.totalorder %v92_v5, %v65_v4  ;;  %vm97_vm7 = vcmp.eq.s32.totalorder %v95_v63, %v65_v4  ;;  %v353_v63 = vld [vmem:[#allocation5 + $0x60] sm:$0xff] }
  0xc2   :  { %v98_v11 = vsel %vm96_vm3, 0.125, %v987_v58  ;;  %v99_v19 = vsel %vm97_vm7, 0.125, %v987_v58  ;;  %v819_v1 = vpack.c.bf16 %v354_v0, %v353_v63 }
  0xc3   :  { %v100_v18 = vadd.f32 %v98_v11, %v88_v12  ;;  %v101_v24 = vadd.f32 %v99_v19, %v89_v21  ;;  %v437_v12 = vld [vmem:[#allocation7 + $0x20] sm:$0xff]  ;;  %v442_v19 = vld [vmem:[#allocation7 + $0x48] sm:$0xff]  ;;  %v443_v21 = vld [vmem:[#allocation7 + $0x50] sm:$0xff] }
  0xc4   :  { %v831_v14 = vpack.c.bf16 %v438_v13, %v437_v12 }
  0xc5   :  { %v104_v2 = vpop.permute.xlu1 %103  ;;  %v107_v10 = vpop.permute.xlu0 %106 }
  0xc6   :  { %vm108_vm6 = vcmp.eq.s32.totalorder %v104_v2, %v65_v4  ;;  %vm109_vm9 = vcmp.eq.s32.totalorder %v107_v10, %v65_v4  ;;  %v355_v2 = vld [vmem:[#allocation5 + $0x70] sm:$0xff]  ;;  %v436_v10 = vld [vmem:[#allocation7 + $0x18] sm:$0xff] }
  0xc7   :  { %v110_v15 = vsel %vm108_vm6, 0.125, %v987_v58  ;;  %v111_v23 = vsel %vm109_vm9, 0.125, %v987_v58  ;;  %v828_v11 = vpack.c.bf16 %v436_v10, %v435_v7 }
  0xc8   :  { %v112_v22 = vadd.f32 %v110_v15, %v100_v18  ;;  %v113_v30 = vadd.f32 %v111_v23, %v101_v24  ;;  %v439_v15 = vld [vmem:[#allocation7 + $0x30] sm:$0xff]  ;;  %v441_v18 = vld [vmem:[#allocation7 + $0x40] sm:$0xff] }
  0xc9   :  { %v445_v24 = vld [vmem:[#allocation7 + $0x60] sm:$0xff] }
  0xca   :  { %v116_v3 = vpop.permute.xlu1 %115  ;;  %v128_v16 = vpop.permute.xlu0 %127 }
  0xcb   :  { %vm120_vm8 = vcmp.eq.s32.totalorder %v116_v3, %v65_v4  ;;  %vm132_vm10 = vcmp.eq.s32.totalorder %v128_v16, %v65_v4  ;;  %v433_v3 = vld [vmem:[#allocation7] sm:$0xff]  ;;  %v440_v16 = vld [vmem:[#allocation7 + $0x38] sm:$0xff] }
  0xcc   :  { %v122_v20 = vsel %vm120_vm8, 0.125, %v987_v58  ;;  %v134_v27 = vsel %vm132_vm10, 0.125, %v987_v58 }
  0xcd   :  { %v124_v25 = vadd.f32 %v122_v20, %v112_v22  ;;  %v837_v20 = vpack.c.bf16 %v442_v19, %v441_v18  ;;  %v444_v22 = vld [vmem:[#allocation7 + $0x58] sm:$0xff] }
  0xce   :  { %v119_v6 = vpop.permute.xlu1 %118  ;;  %v840_v23 = vpack.c.bf16 %v444_v22, %v443_v21 }
  0xcf   :  { %vm121_vm11 = vcmp.eq.s32.totalorder %v119_v6, %v65_v4  ;;  %v143_v29 = vpop.permute.xlu0 %142  ;;  %v136_v33 = vadd.f32 %v134_v27, %v124_v25  ;;  %v434_v6 = vld [vmem:[#allocation7 + $0x8] sm:$0xff] }
  0xd0   :  { %v123_v28 = vsel %vm121_vm11, 0.125, %v987_v58  ;;  %vm145_vm14 = vcmp.eq.s32.totalorder %v143_v29, %v65_v4  ;;  %v825_v9 = vpack.c.bf16 %v434_v6, %v433_v3  ;;  %v446_v25 = vld [vmem:[#allocation7 + $0x68] sm:$0xff] }
  0xd1   :  { %v125_v34 = vadd.f32 %v123_v28, %v113_v30  ;;  %v147_v38 = vsel %vm145_vm14, 0.125, %v987_v58  ;;  %v541_v30 = vld [vmem:[%s1178_s4] ss:$0 sm:$0xff] }
  0xd3   :  { %v131_v17 = vpop.permute.xlu1 %130 }
  0xd4   :  { %vm133_vm12 = vcmp.eq.s32.totalorder %v131_v17, %v65_v4  ;;  %v834_v17 = vpack.c.bf16 %v440_v16, %v439_v15 }
  0xd5   :  { %v135_v31 = vsel %vm133_vm12, 0.125, %v987_v58 }
  0xd6   :  { %v137_v36 = vadd.f32 %v135_v31, %v125_v34 }
  0xd8   :  { %v140_v26 = vpop.permute.xlu1 %139  ;;  %v149_v44 = vadd.f32 %v147_v38, %v137_v36  ;;  %v448_v36 = vld [vmem:[#allocation7 + $0x78] sm:$0xff] }
  0xd9   :  { %vm144_vm13 = vcmp.eq.s32.totalorder %v140_v26, %v65_v4  ;;  %v843_v26 = vpack.c.bf16 %v446_v25, %v445_v24 }
  0xda   :  { %v146_v32 = vsel %vm144_vm13, 0.125, %v987_v58 }
  0xdb   :  { %v148_v37 = vadd.f32 %v146_v32, %v136_v33 }
  0xdd   :  { %v152_v35 = vpop.permute.xlu1 %151 }
  0xde   :  { %vm156_vm15 = vcmp.eq.s32.totalorder %v152_v35, %v65_v4  ;;  %v447_v35 = vld [vmem:[#allocation7 + $0x70] sm:$0xff] }
  0xdf   :  { %v158_v39 = vsel %vm156_vm15, 0.125, %v987_v58 }
  0xe0   :  { %v160_v40 = vadd.f32 %v158_v39, %v148_v37  ;;  %v846_v37 = vpack.c.bf16 %v448_v36, %v447_v35 }
  0xe1   :  { %v155_v43 = vpop.permute.xlu1 %154 }
  0xe2   :  { %vm157_vm1 = vcmp.eq.s32.totalorder %v155_v43, %v65_v4  ;;  %680 = vmatmul.mubr.f32.vlgmr.msra.gmra.mrb[0].mxu1 %v160_v40  ;;  %v356_v4 = vld [vmem:[#allocation5 + $0x78] sm:$0xff] }
  0xe3   :  { %v159_v45 = vsel %vm157_vm1, 0.125, %v987_v58  ;;  %749 = vmatprep.mubr.msk.f32.mxu1 %vm986_vm0, %v987_v58  ;;  %v822_v5 = vpack.c.bf16 %v356_v4, %v355_v2  ;;  %826 = vmatpush3.bf16.msra.mxu1 %v825_v9 }
  0xe4   :  { %v161_v47 = vadd.f32 %v159_v45, %v149_v44  ;;  %827 = vmatprep.subr.bf16.mxu1 %v980_v8 }
  0xe6   :  { %645 = vmatmul.mubr.f32.vlgmr.msra.gmra.mrb[0].mxu0 %v161_v47 }
  0xe7   :  { %802 = vmatpush3.bf16.msra.mxu0 %v801_v46  ;;  %714 = vmatprep.mubr.msk.f32.mxu0 %vm986_vm0, %v987_v58  ;;  %v351_v58 = vld [vmem:[#allocation5 + $0x50] sm:$0xff] }
  0xe8   :  { %803 = vmatprep.subr.bf16.mxu0 %v980_v8  ;;  %v816_v62 = vpack.c.bf16 %v352_v61, %v351_v58  ;;  %829 = vmatpush3.bf16.msra.mxu1 %v828_v11 }
  0xe9   :  { %830 = vmatprep.subr.bf16.mxu1 %v980_v8 }
  0xeb   :  { %805 = vmatpush3.bf16.msra.mxu0 %v804_v50 }
  0xec   :  { %806 = vmatprep.subr.bf16.mxu0 %v980_v8  ;;  %832 = vmatpush3.bf16.msra.mxu1 %v831_v14 }
  0xed   :  { %833 = vmatprep.subr.bf16.mxu1 %v980_v8 }
  0xef   :  { %808 = vmatpush3.bf16.msra.mxu0 %v807_v53 }
  0xf0   :  { %809 = vmatprep.subr.bf16.mxu0 %v980_v8  ;;  %835 = vmatpush3.bf16.msra.mxu1 %v834_v17 }
  0xf1   :  { %836 = vmatprep.subr.bf16.mxu1 %v980_v8 }
  0xf3   :  { %811 = vmatpush3.bf16.msra.mxu0 %v810_v56 }
  0xf4   :  { %812 = vmatprep.subr.bf16.mxu0 %v980_v8  ;;  %838 = vmatpush3.bf16.msra.mxu1 %v837_v20 }
  0xf5   :  { %839 = vmatprep.subr.bf16.mxu1 %v980_v8 }
  0xf7   :  { %814 = vmatpush3.bf16.msra.mxu0 %v813_v60 }
  0xf8   :  { %815 = vmatprep.subr.bf16.mxu0 %v980_v8  ;;  %841 = vmatpush3.bf16.msra.mxu1 %v840_v23 }
  0xf9   :  { %842 = vmatprep.subr.bf16.mxu1 %v980_v8 }
  0xfb   :  { %817 = vmatpush3.bf16.msra.mxu0 %v816_v62 }
  0xfc   :  { %818 = vmatprep.subr.bf16.mxu0 %v980_v8  ;;  %844 = vmatpush3.bf16.msra.mxu1 %v843_v26 }
  0xfd   :  { %845 = vmatprep.subr.bf16.mxu1 %v980_v8 }
  0xff   :  { %820 = vmatpush3.bf16.msra.mxu0 %v819_v1 }
 0x100   :  { %821 = vmatprep.subr.bf16.mxu0 %v980_v8  ;;  %847 = vmatpush3.bf16.msra.mxu1 %v846_v37  ;;  %v542_v8 = vld [vmem:[%s1178_s4 + $0x1] ss:$0 sm:$0xff] }
 0x103   :  { %823 = vmatpush3.bf16.msra.mxu0 %v822_v5 }
 0x1b5   :  { %v330_v27 = vpop.f32.mrb[0].mxu1 }
 0x1b6   :  { %v681_v28 = vpop.f32.mrb[1].mxu1 }
 0x1b9   :  { %v260_v29 = vpop.f32.mrb[0].mxu0 }
 0x1ba   :  { %v331_v31 = vadd.f32 %v330_v27, %v260_v29  ;;  %v646_v32 = vpop.f32.mrb[1].mxu0 }
 0x1bc   :  { %v339_v33 = vadd.f32 %v541_v30, %v331_v31 }
 0x1be   :  { %v340_v34 = vmax.f32 %v339_v33, 0.0 }
 0x1c0   :  { %715 = vmatmul.mubr.f32.vlgmr.msra.gmra.mrb[2].mxu0 %v340_v34 }
 0x293   :  { %v428_v38 = vpop.f32.mrb[2].mxu0 }
 0x294   :  { %v429_v39 = vadd.f32 %v542_v8, %v428_v38  ;;  %v716_v40 = vpop.f32.mrb[3].mxu0 }
 0x296   :  { %v432_v41 = vmax.f32 %v429_v39, 0.0 }
 0x298   :  { %750 = vmatmul.mubr.f32.vlgmr.msra.gmra.mrb[2].mxu1 %v432_v41 }
 0x36b   :  { %v520_v43 = vpop.f32.mrb[2].mxu1 }
 0x36c   :  { %v521_v44 = vadd.f32 %v543_v42, %v520_v43  ;;  %v751_v45 = vpop.f32.mrb[3].mxu1 }
 0x36e   :  { %524 = vst [vmem:[#allocation8] sm:$0xff] %v521_v44 }
 0x36f   :  { %955 = shalt.err (!%p952_p0)
}
 0x370   :  { %s956_s2 = scalar_lea.hbm %s1179_s5, 128 }
 0x371   :  { %p957_p1 = scmp.ne.s32.totalorder %s1179_s5, %s956_s2  ;;  %p960_p2 = scmp.lt.u32.totalorder %s956_s2, %s1179_s5 }
 0x373   :  { %p962_p3 = pnand %p960_p2, %p957_p1 }
 0x375   :  { %965 = shalt.err (!%p962_p3)
}
 0x376   :  { %534 = dma.vmem_to_hbm [thread:$0]  %s532_s13, 128, %s1179_s5, [#allocation4]  }
 0x377   :  { %970 = dma.done.wait [#allocation4], 128  }
 0x378   :  { %971 = vsyncadd [#allocation4], 4294967168 }
 0x379   :  { %538 = vsyncpa [#allocation3], 1 }
 0x37a   :  { %539 = vsyncpa [#allocation6], 1 }
 0x37b   :  { %540 = vsyncpa [#allocation4], 1 }

</bundles_post_ra>
